<compile_context>
chip_gen: v5e
topology: v5e:2x2
jax: 0.10.0
libtpu: 0.0.40
codegen_flags: <defaults>
</compile_context>

<pallas_src>
import jax
import jax.numpy as jnp
from jax import lax
from jax.experimental import pallas as pl
from jax.experimental.pallas import tpu as pltpu


def _cdiv(a, b):
    return -(-a // b)


def _round_up(x, m):
    return _cdiv(x, m) * m


def _cosine_sim_kernel(x_ref, y_ref, inv_r_ref, inv_c_ref, sim_ref):
    """One (TM, TN) tile of sim = (X @ Xᵀ) * inv_norm_row * inv_norm_colᵀ.

    The output block's index_map ignores k, so sim_ref stays VMEM-resident
    across the innermost (arbitrary) k axis and doubles as the f32 accumulator.
    """
    k = pl.program_id(2)

    @pl.when(k == 0)
    def _():
        sim_ref[...] = jnp.zeros_like(sim_ref)

    # A·Bᵀ on the MXU without materializing a transpose: contract the last
    # (feature) dim of both tiles.  bf16 operands, f32 accumulation.
    sim_ref[...] += lax.dot_general(
        x_ref[...],
        y_ref[...],
        dimension_numbers=(((1,), (1,)), ((), ())),
        preferred_element_type=jnp.float32,
    )

    @pl.when(k == pl.num_programs(2) - 1)
    def _():
        # Two broadcast multiplies instead of a B^2 divide; rsqrt was hoisted
        # out of the grid loop entirely (computed once, outside the kernel).
        sim_ref[...] *= inv_r_ref[...] * inv_c_ref[...]


def _choose_axis_tiling(extent, max_tile, packing):
    """Pick (#tiles, tile, padded_extent) so tile is lane/sublane aligned and
    padding is minimal (tile shrinks for small extents instead of padding up)."""
    nt = _cdiv(extent, max_tile)
    tile = _round_up(_cdiv(extent, nt), packing)
    return nt, tile, nt * tile


def ntxent_forward(hidden_features, hidden_uncers=None, temperature=0.02, *,
                   tile_m=512, tile_n=512, tile_k=512,
                   compute_dtype=jnp.bfloat16, force_pallas=False):
    """Pallas equivalent of NTXentLoss.forward.

    Returns the [B, B] cosine-similarity matrix (what the PyTorch forward
    computes before printing its shape and exiting).
    """
    del hidden_uncers, temperature  # unused by the PyTorch forward path
    B, D = hidden_features.shape
    eps = 1e-8

    x_f32 = hidden_features.astype(jnp.float32)
    # Inverse row norms, once, in f32 (torch.nn.CosineSimilarity semantics:
    # each norm clamped at eps).
    sq = jnp.sum(x_f32 * x_f32, axis=-1)                 # [B]
    inv_norm = lax.rsqrt(jnp.maximum(sq, eps * eps))     # [B]

    # Small-problem fallback: a padded Pallas launch is pure overhead here.
    if not force_pallas and B <= 128 and D <= 512:
        xn = x_f32 * inv_norm[:, None]
        sim = xn @ xn.T
        print(sim.shape)
        # TODO(synk): PyTorch forward calls exit() here; no kernel equivalent.
        return sim

    item = jnp.dtype(compute_dtype).itemsize
    sublane = 32 // item                                  # 8 (f32) / 16 (bf16)

    # Independent row / col / K tiling (fixes grid truncation + over-padding).
    nt_r, TM, Bp_r = _choose_axis_tiling(B, tile_m, sublane)
    nt_c, TN, Bp_c = _choose_axis_tiling(B, tile_n, 128)
    nt_k, TK, Dp = _choose_axis_tiling(D, tile_k, 128)

    # v7x has 2 TensorCores sharded over the parallel axes: make sure a big
    # enough problem produces at least 2 output tiles.
    if nt_r * nt_c == 1 and B >= 256:
        nt_r, TM, Bp_r = _choose_axis_tiling(B, _cdiv(_round_up(B, sublane), 2),
                                             sublane)

    x_c = hidden_features.astype(compute_dtype)
    # Separate row-/col-operand paddings (Bp_r and Bp_c may differ).
    xr = jnp.zeros((Bp_r, Dp), dtype=compute_dtype).at[:B, :D].set(x_c)
    xc = jnp.zeros((Bp_c, Dp), dtype=compute_dtype).at[:B, :D].set(x_c)
    # Padded rows/cols get inv_norm = 0 (and zero features) -> padded sim = 0.
    inv_r = jnp.zeros((Bp_r, 1), jnp.float32).at[:B, 0].set(inv_norm)
    inv_c = jnp.zeros((1, Bp_c), jnp.float32).at[0, :B].set(inv_norm)

    grid = (nt_r, nt_c, nt_k)

    # Actual traffic: the row operand is streamed once per column tile and
    # vice versa; output written once in f32.
    bytes_accessed = (nt_c * Bp_r * Dp * item
                      + nt_r * Bp_c * Dp * item
                      + Bp_r * Bp_c * 4
                      + (Bp_r + Bp_c) * 4)
    flops = 2 * Bp_r * Bp_c * Dp

    # VMEM budget (double-buffered input streams + double-buffered f32 output
    # block, which is also the accumulator).  Only raise the scoped limit if
    # the default (16 MiB on v5e) would be tight; cap at v7x's 64 MiB/TC.
    vmem_est = (2 * (TM * TK + TN * TK) * item
                + 2 * TM * TN * 4
                + 2 * (TM + TN) * 4)
    cp_kwargs = dict(dimension_semantics=("parallel", "parallel", "arbitrary"))
    if vmem_est > 12 * 1024 * 1024:
        cp_kwargs["vmem_limit_bytes"] = min(int(vmem_est * 1.5) + (1 << 20),
                                            64 * 1024 * 1024)

    sim_padded = pl.pallas_call(
        _cosine_sim_kernel,
        out_shape=jax.ShapeDtypeStruct((Bp_r, Bp_c), jnp.float32),
        grid_spec=pltpu.PrefetchScalarGridSpec(
            num_scalar_prefetch=0,
            grid=grid,
            in_specs=[
                # Row tiles of X: (TM, TK) at (i, k).
                pl.BlockSpec((TM, TK), lambda i, j, k: (i, k)),
                # Col tiles of X: (TN, TK) at (j, k).
                pl.BlockSpec((TN, TK), lambda i, j, k: (j, k)),
                # Precomputed inverse norms, broadcast along rows / cols.
                pl.BlockSpec((TM, 1), lambda i, j, k: (i, 0)),
                pl.BlockSpec((1, TN), lambda i, j, k: (0, j)),
            ],
            out_specs=pl.BlockSpec((TM, TN), lambda i, j, k: (i, j)),
        ),
        compiler_params=pltpu.CompilerParams(**cp_kwargs),
        cost_estimate=pl.CostEstimate(
            flops=flops,
            transcendentals=0,
            bytes_accessed=bytes_accessed,
        ),
    )(xr, xc, inv_r, inv_c)

    sim = sim_padded[:B, :B]
    # Mirror the PyTorch forward's print of the similarity-matrix shape.
    print(sim.shape)
    # TODO(synk): PyTorch forward calls exit() here; no kernel equivalent —
    # we return the similarity matrix instead.
    return sim


def _cosine_sim_ref(x, eps=1e-8):
    """Pure-JAX reference with torch.nn.CosineSimilarity semantics
    (each row norm clamped at eps, matching the kernel)."""
    x = x.astype(jnp.float32)
    norm = jnp.sqrt(jnp.sum(x * x, axis=-1, keepdims=True))
    xn = x / jnp.maximum(norm, eps)
    return xn @ xn.T


if __name__ == "__main__":
    key = jax.random.PRNGKey(0)
    B, D = 8, 32  # small [batch, hidden] shapes consistent with the module
    k1, k2 = jax.random.split(key)
    hidden_features = jax.random.normal(k1, (B, D), dtype=jnp.float32)
    hidden_uncers = jax.nn.softplus(jax.random.normal(k2, (B, D), dtype=jnp.float32))

    # force_pallas=True so the Pallas kernel (not the small-problem XLA
    # fallback) is exercised at this tiny test shape.
    sim = ntxent_forward(hidden_features, hidden_uncers, force_pallas=True)
    sim = jax.block_until_ready(sim)

    ref = _cosine_sim_ref(hidden_features)
    assert sim.shape == (B, B)
    err = float(jnp.max(jnp.abs(sim - ref)))
    # bf16 operands with f32 accumulation: cosine values accurate to ~1e-3.
    assert err < 2e-2, f"mismatch vs reference: {err}"
    print("KERNEL_OK")
</pallas_src>

<mosaic_0001>
module attributes {stable_mosaic.version = 11 : i64} {
  func.func @_cosine_sim_kernel(%arg0: i32, %arg1: i32, %arg2: i32, %arg3: memref<16x128xbf16, #tpu.memory_space<vmem>>, %arg4: memref<128x128xbf16, #tpu.memory_space<vmem>>, %arg5: memref<16x1xf32, #tpu.memory_space<vmem>>, %arg6: memref<1x128xf32, #tpu.memory_space<vmem>>, %arg7: memref<16x128xf32, #tpu.memory_space<vmem>>) attributes {dimension_semantics = [#tpu.dimension_semantics<parallel>, #tpu.dimension_semantics<parallel>, #tpu.dimension_semantics<arbitrary>], iteration_bounds = array<i64: 1, 1, 1>, scalar_prefetch = 0 : i64, scratch_operands = 0 : i64, tpu.core_type = #tpu.core_type<tc>, window_params = [{transform_indices = @transform_0, window_bounds = array<i64: 16, 128>}, {transform_indices = @transform_1, window_bounds = array<i64: 128, 128>}, {transform_indices = @transform_2, window_bounds = array<i64: 16, 1>}, {transform_indices = @transform_3, window_bounds = array<i64: 1, 128>}, {transform_indices = @transform_4, window_bounds = array<i64: 16, 128>}]} {
    %c0_i32 = arith.constant 0 : i32
    %0 = arith.cmpi eq, %arg2, %c0_i32 : i32
    %1 = arith.extui %0 : i1 to i32
    %c0_i32_0 = arith.constant 0 : i32
    %2 = arith.cmpi ne, %1, %c0_i32_0 : i32
    scf.if %2 {
      %cst_10 = arith.constant 0.000000e+00 : f32
      %12 = vector.broadcast %cst_10 : f32 to vector<16x128xf32>
      %c0_11 = arith.constant 0 : index
      %c0_12 = arith.constant 0 : index
      %13 = vector.load %arg7[%c0_11, %c0_12] : memref<16x128xf32, #tpu.memory_space<vmem>>, vector<16x128xf32>
      tpu.vector_store %arg7[%c0_11, %c0_12], %12 {strides = array<i32>} : memref<16x128xf32, #tpu.memory_space<vmem>>, vector<16x128xf32>,
    } else {
    }
    %c0 = arith.constant 0 : index
    %c0_1 = arith.constant 0 : index
    %3 = vector.load %arg7[%c0, %c0_1] : memref<16x128xf32, #tpu.memory_space<vmem>>, vector<16x128xf32>
    %c0_2 = arith.constant 0 : index
    %c0_3 = arith.constant 0 : index
    %4 = vector.load %arg3[%c0_2, %c0_3] : memref<16x128xbf16, #tpu.memory_space<vmem>>, vector<16x128xbf16>
    %c0_4 = arith.constant 0 : index
    %c0_5 = arith.constant 0 : index
    %5 = vector.load %arg4[%c0_4, %c0_5] : memref<128x128xbf16, #tpu.memory_space<vmem>>, vector<128x128xbf16>
    %cst = arith.constant dense<0.000000e+00> : vector<16x128xf32>
    %6 = tpu.matmul %4, %5, %cst {dimension_numbers = #tpu.dot_dimension_numbers<[1], [1], [0], [0], [0, 0, 1, 0], [], []>} : vector<16x128xbf16>, vector<128x128xbf16>, vector<16x128xf32> -> vector<16x128xf32>
    %7 = arith.addf %3, %6 : vector<16x128xf32>
    %c0_6 = arith.constant 0 : index
    %c0_7 = arith.constant 0 : index
    %8 = vector.load %arg7[%c0_6, %c0_7] : memref<16x128xf32, #tpu.memory_space<vmem>>, vector<16x128xf32>
    tpu.vector_store %arg7[%c0_6, %c0_7], %7 {strides = array<i32>} : memref<16x128xf32, #tpu.memory_space<vmem>>, vector<16x128xf32>,
    %c0_i32_8 = arith.constant 0 : i32
    %9 = arith.cmpi eq, %arg2, %c0_i32_8 : i32
    %10 = arith.extui %9 : i1 to i32
    %c0_i32_9 = arith.constant 0 : i32
    %11 = arith.cmpi ne, %10, %c0_i32_9 : i32
    scf.if %11 {
      %c0_10 = arith.constant 0 : index
      %c0_11 = arith.constant 0 : index
      %12 = vector.load %arg7[%c0_10, %c0_11] : memref<16x128xf32, #tpu.memory_space<vmem>>, vector<16x128xf32>
      %c0_12 = arith.constant 0 : index
      %c0_13 = arith.constant 0 : index
      %13 = vector.load %arg5[%c0_12, %c0_13] : memref<16x1xf32, #tpu.memory_space<vmem>>, vector<16x1xf32>
      %c0_14 = arith.constant 0 : index
      %c0_15 = arith.constant 0 : index
      %14 = vector.load %arg6[%c0_14, %c0_15] : memref<1x128xf32, #tpu.memory_space<vmem>>, vector<1x128xf32>
      %15 = vector.broadcast %13 : vector<16x1xf32> to vector<16x128xf32>
      %16 = vector.broadcast %14 : vector<1x128xf32> to vector<16x128xf32>
      %17 = arith.mulf %15, %16 : vector<16x128xf32>
      %18 = arith.mulf %12, %17 : vector<16x128xf32>
      %c0_16 = arith.constant 0 : index
      %c0_17 = arith.constant 0 : index
      %19 = vector.load %arg7[%c0_16, %c0_17] : memref<16x128xf32, #tpu.memory_space<vmem>>, vector<16x128xf32>
      tpu.vector_store %arg7[%c0_16, %c0_17], %18 {strides = array<i32>} : memref<16x128xf32, #tpu.memory_space<vmem>>, vector<16x128xf32>,
    } else {
    }
    return
  }
  func.func @transform_0(%arg0: i32, %arg1: i32, %arg2: i32) -> (i32, i32) {
    %c0_i32 = arith.constant 0 : i32
    return %arg0, %arg2 : i32, i32
  }
  func.func @transform_1(%arg0: i32, %arg1: i32, %arg2: i32) -> (i32, i32) {
    %c0_i32 = arith.constant 0 : i32
    return %arg1, %arg2 : i32, i32
  }
  func.func @transform_2(%arg0: i32, %arg1: i32, %arg2: i32) -> (i32, i32) {
    %c0_i32 = arith.constant 0 : i32
    %c0_i32_0 = arith.constant 0 : i32
    return %arg0, %c0_i32 : i32, i32
  }
  func.func @transform_3(%arg0: i32, %arg1: i32, %arg2: i32) -> (i32, i32) {
    %c0_i32 = arith.constant 0 : i32
    %c0_i32_0 = arith.constant 0 : i32
    return %c0_i32, %arg1 : i32, i32
  }
  func.func @transform_4(%arg0: i32, %arg1: i32, %arg2: i32) -> (i32, i32) {
    %c0_i32 = arith.constant 0 : i32
    return %arg0, %arg1 : i32, i32
  }
}

</mosaic_0001>

<bundles_post_ra>
// kernel: tpu_custom_call.1
= control target key start
LH: loop header
LB: loop body
LE: loop exit
PB: predicated region body
PF: predicated region fallthrough
CT: control target
= control target key end

     0   :  { %9 = vsyncpa [#allocation3], 0  ;;  %s335_s0 = inlined_call_operand.vmem [shape: bf16[16,128], index: 0, kind: input, shape index: {}]   ;;  %s336_s1 = inlined_call_operand.hbm [shape: bf16[128,128], index: 1, kind: input, shape index: {}]   ;;  %s337_s2 = inlined_call_operand.vmem [shape: f32[16,1], index: 2, kind: input, shape index: {}]   ;;  %s338_s3 = inlined_call_operand.vmem [shape: f32[1,128], index: 3, kind: input, shape index: {}]   ;;  %s339_s4 = inlined_call_operand.hbm [shape: f32[16,128], index: 4, kind: output, shape index: {}]  }
   0x1   :  { %10 = vsyncpa [#allocation4], 0  ;;  %s17_s17 = sshll.u32 %s336_s1, 4  ;;  %s285_s18 = smov [#allocation2]   ;;  %s18_s17 = int_to_ptr.hbm [resolvable:$true] %s17_s17 }
   0x2   :  { %s19_s19 = sshll.u32 %s285_s18, 4  ;;  %s286_s20 = smov 64   ;;  %s20_s19 = int_to_ptr.vmem [resolvable:$true] %s19_s19 }
   0x3   :  { %s287_s21 = smov 4  }
   0x4   :  { %25 = dma.hbm_to_vmem [thread:$0]  %s18_s17, 1024, %s20_s19, [#allocation3], %s286_s20, %s286_s20, %s287_s21  }
   0x5   :  { %281 = dma.done.wait [#allocation3], 1024  }
   0x6   :  { %282 = vsyncadd [#allocation3], 4294966272  ;;  %v222_v0 = vld [vmem:[#allocation2 + $0x38] sm:$0xff]  ;;  %v221_v1 = vld [vmem:[#allocation2 + $0x30] sm:$0xff]  ;;  %v288_v6 = vmov 0   ;;  %s165_s6 = sshll.u32 %s339_s4, 4  ;;  %s166_s6 = int_to_ptr.hbm [resolvable:$true] %s165_s6 }
   0x7   :  { %114 = vmatpush.bf16.xpose.msra.mxu0 %v222_v0  ;;  %v220_v2 = vld [vmem:[#allocation2 + $0x28] sm:$0xff]  ;;  %v219_v3 = vld [vmem:[#allocation2 + $0x20] sm:$0xff]  ;;  %v218_v4 = vld [vmem:[#allocation2 + $0x18] sm:$0xff]  ;;  %231 = vset.pattern.permute.xlu0 %v288_v6 }
   0x8   :  { %v137_v5 = vld [vmem:[%s337_s2] sm:$0xff]  ;;  %v217_v7 = vld [vmem:[#allocation2 + $0x10] sm:$0xff]  ;;  %v138_v8 = vld [vmem:[%s337_s2 + $0x8] sm:$0xff]  ;;  %s289_s2 = smov [#allocation5]  }
   0x9   :  { %142 = vperm.xlu0 %231, %v137_v5   ;;  %v216_v9 = vld [vmem:[#allocation2 + $0x8] sm:$0xff]  ;;  %v215_v10 = vld [vmem:[#allocation2] sm:$0xff]  ;;  %s163_s29 = sshll.u32 %s289_s2, 4  ;;  %s164_s29 = int_to_ptr.vmem [resolvable:$true] %s163_s29 }
   0xa   :  { %v214_v11 = vld [vmem:[%s335_s0] sm:$0xff]  ;;  %s290_s0 = smov 128  }
   0xb   :  { %v232_v12 = vld [vmem:[%s338_s3] ss:$0 sm:$0xff]  ;;  %s291_s3 = smov 8  }
   0xf   :  { %115 = vmatpush.bf16.xpose.msra.mxu0 %v221_v1 }
  0x11   :  { %147 = vperm.xlu0 %231, %v138_v8  }
  0x17   :  { %116 = vmatpush.bf16.xpose.msra.mxu0 %v220_v2 }
  0x1f   :  { %117 = vmatpush.bf16.xpose.msra.mxu0 %v219_v3 }
  0x27   :  { %118 = vmatpush.bf16.xpose.msra.mxu0 %v218_v4 }
  0x2f   :  { %119 = vmatpush.bf16.xpose.msra.mxu0 %v217_v7 }
  0x37   :  { %120 = vmatpush.bf16.xpose.msra.mxu0 %v216_v9 }
  0x3f   :  { %121 = vmatpush.bf16.xpose.msra.mxu0 %v215_v10 }
  0x46   :  { %122 = vmatmul.bf16.vlgmr.msra.gmra.mxu0 %v214_v11 }
  0x7b   :  { %v143_v13 = vpop.permute.xlu0 %142 }
  0x7c   :  { %v153_v14 = vmul.f32 %v232_v12, %v143_v13 }
  0x83   :  { %v148_v17 = vpop.permute.xlu0 %147 }
  0x84   :  { %v154_v19 = vmul.f32 %v232_v12, %v148_v17 }
  0xc3   :  { %v123_v15 = vpop.f32.mrf.mxu0 }
  0xc4   :  { %v155_v16 = vmul.f32 %v153_v14, %v123_v15 }
  0xc6   :  { %157 = vst [vmem:[#allocation5] sm:$0xff] %v155_v16 }
  0xcb   :  { %v125_v18 = vpop.f32.mrf.mxu0 }
  0xcc   :  { %v156_v20 = vmul.f32 %v154_v19, %v125_v18 }
  0xce   :  { %158 = vst [vmem:[#allocation5 + $0x8] sm:$0xff] %v156_v20 }
  0xcf   :  { %171 = dma.vmem_to_hbm [thread:$0]  %s164_s29, 256, %s166_s6, [#allocation4], %s290_s0, %s290_s0, %s291_s3  }
  0xd0   :  { %283 = dma.done.wait [#allocation4], 256  }
  0xd1   :  { %284 = vsyncadd [#allocation4], 4294967040 }
  0xd2   :  { %176 = vsyncpa [#allocation3], 1 }
  0xd3   :  { %177 = vsyncpa [#allocation4], 1 }

</bundles_post_ra>
